<compile_context>
chip_gen: v6e
topology: v6e:2x2x1
jax: 0.10.0
libtpu: 0.0.40
codegen_flags: <defaults>
</compile_context>

<pallas_src>
import functools

import jax
import jax.numpy as jnp
from jax.experimental import pallas as pl
from jax.experimental.pallas import tpu as pltpu


# ----------------------------- kernel helpers ------------------------------


def _swish(z):
    # z * sigmoid(z); sigmoid lowers to the EUP (separate bundle slot).
    return z * jax.nn.sigmoid(z)


def _layernorm(z, gamma, beta, eps=1e-5):
    # One-pass form: the two XLU reductions (mean, mean of squares) are
    # independent and can overlap; matches nn.LayerNorm to ~1e-6.
    m = jnp.mean(z, axis=-1, keepdims=True)
    ms = jnp.mean(z * z, axis=-1, keepdims=True)
    var = ms - m * m
    return (z - m) * jax.lax.rsqrt(var + eps) * gamma + beta


def _residual_block_kernel(*refs, has_proj):
    if has_proj:
        (x_ref, t_ref, c_ref,
         g1_ref, b1_ref, w1_ref, b1t_ref,
         wt_ref,
         g2_ref, b2_ref, w2_ref, b2c_ref,
         wc_ref,
         g3_ref, b3_ref, w3_ref, wb3_ref,
         ws_ref, bs_ref,
         o_ref) = refs
    else:
        (x_ref, t_ref, c_ref,
         g1_ref, b1_ref, w1_ref, b1t_ref,
         wt_ref,
         g2_ref, b2_ref, w2_ref, b2c_ref,
         wc_ref,
         g3_ref, b3_ref, w3_ref, wb3_ref,
         o_ref) = refs
        ws_ref = bs_ref = None

    mx = w1_ref.dtype  # bf16 matmul-operand dtype; accumulation stays f32.
    f32 = jnp.float32

    # Hoisted h-independent embeddings: two MXU ops the scheduler can issue
    # while the LayerNorm XLU reductions of the main chain are in flight.
    te = jnp.dot(_swish(t_ref[...].astype(f32)).astype(mx), wt_ref[...],
                 preferred_element_type=f32)
    ce = jnp.dot(_swish(c_ref[...].astype(f32)).astype(mx), wc_ref[...],
                 preferred_element_type=f32)

    # h = lin1(swish(norm1(x))) + time_emb(swish(t))   (biases pre-folded: b1t)
    a1 = _swish(_layernorm(x_ref[...].astype(f32), g1_ref[...], b1_ref[...]))
    h = jnp.dot(a1.astype(mx), w1_ref[...], preferred_element_type=f32)
    h = h + te + b1t_ref[...]

    # h = lin2(swish(norm2(h))) + cond_emb(swish(cond))   (biases pre-folded: b2c)
    a2 = _swish(_layernorm(h, g2_ref[...], b2_ref[...]))
    h = jnp.dot(a2.astype(mx), w2_ref[...], preferred_element_type=f32)
    h = h + ce + b2c_ref[...]

    # h = lin3(swish(norm3(h)))
    a3 = _swish(_layernorm(h, g3_ref[...], b3_ref[...]))
    h = jnp.dot(a3.astype(mx), w3_ref[...], preferred_element_type=f32)
    h = h + wb3_ref[...]

    # + shortcut(x) -- re-read x from the resident VMEM input tile (vld slot has
    # slack) instead of keeping it live across all five matmuls.
    if has_proj:
        sc = jnp.dot(x_ref[...].astype(mx), ws_ref[...],
                     preferred_element_type=f32) + bs_ref[...]
    else:
        sc = x_ref[...].astype(f32)

    o_ref[...] = (h + sc).astype(o_ref.dtype)


# ----------------------------- wrapper / params -----------------------------


def _choose_batch_tile(B, batch_tile):
    """Pick a sublane-aligned row-tile; >= 2 grid steps when B >= 16 (megacore)."""
    if B < 16:
        return B
    n_tiles = max(2, pl.cdiv(B, batch_tile))
    tm = pl.cdiv(B, n_tiles)
    tm = ((tm + 7) // 8) * 8          # align to the 8-row sublane granule
    return min(tm, batch_tile)


def residual_block_forward(x, t, cond, params, *, batch_tile=512):
    """Pallas equivalent of ResidualBlock.forward(x, t, cond).

    x:    (B, in_dim)    float32
    t:    (B, time_dim)  float32
    cond: (B, cond_dim)  float32
    params: LayerNorm (1, dim) gammas/betas (f32), Linear weights stored
            pre-transposed (fan_in, fan_out) in bf16, biases (1, fan_out) f32.
    returns (B, out_dim) float32
    """
    B, in_dim = x.shape
    time_dim = t.shape[1]
    cond_dim = cond.shape[1]
    out_dim = params['lin1_w'].shape[1]
    has_proj = 'shortcut_w' in params
    f32 = jnp.float32

    # ---- batch tiling (pipelined + megacore-shardable); pad ragged batches ----
    tm = _choose_batch_tile(B, batch_tile)
    grid_m = pl.cdiv(B, tm)
    B_pad = grid_m * tm
    if B_pad != B:
        pad = ((0, B_pad - B), (0, 0))
        x_in, t_in, c_in = jnp.pad(x, pad), jnp.pad(t, pad), jnp.pad(cond, pad)
    else:
        x_in, t_in, c_in = x, t, cond

    # ---- fold constant bias pairs once per call (outside the kernel) ----
    b1t = params['lin1_b'].astype(f32) + params['time_b'].astype(f32)
    b2c = params['lin2_b'].astype(f32) + params['cond_b'].astype(f32)

    param_args = [
        params['norm1_g'], params['norm1_b'], params['lin1_w'], b1t,
        params['time_w'],
        params['norm2_g'], params['norm2_b'], params['lin2_w'], b2c,
        params['cond_w'],
        params['norm3_g'], params['norm3_b'], params['lin3_w'], params['lin3_b'],
    ]
    if has_proj:
        param_args += [params['shortcut_w'], params['shortcut_b']]

    def row_spec(dim):
        return pl.BlockSpec((tm, dim), lambda i: (i, 0))

    def resident_spec(arr):
        # Constant index map -> fetched once, VMEM-resident for the whole grid.
        # Single-buffered: double-buffering a never-changing block wastes VMEM.
        r, c = arr.shape
        return pl.BlockSpec((r, c), lambda i: (0, 0), pipeline_mode=pl.Buffered(1))

    in_specs = [row_spec(in_dim), row_spec(time_dim), row_spec(cond_dim)]
    in_specs += [resident_spec(a) for a in param_args]

    # ---- explicit VMEM budget: weights once + double-buffered act/out tiles ----
    weight_bytes = sum(int(a.size) * a.dtype.itemsize for a in param_args)
    act_bytes = 2 * tm * (in_dim + time_dim + cond_dim) * x.dtype.itemsize
    out_bytes = 2 * tm * out_dim * x.dtype.itemsize
    vmem_limit = int(1.5 * (weight_bytes + act_bytes + out_bytes)) + (8 << 20)
    vmem_limit = max(32 << 20, min(vmem_limit, 128 << 20))

    # ---- advisory cost estimate for XLA's scheduler ----
    matmul_flops = 2 * B_pad * (in_dim * out_dim + time_dim * out_dim
                                + cond_dim * out_dim + 2 * out_dim * out_dim)
    if has_proj:
        matmul_flops += 2 * B_pad * in_dim * out_dim
    bytes_accessed = (weight_bytes
                      + B_pad * (in_dim + time_dim + cond_dim + out_dim)
                      * x.dtype.itemsize)
    transcendentals = B_pad * (in_dim + time_dim + cond_dim + 2 * out_dim)

    kernel = functools.partial(_residual_block_kernel, has_proj=has_proj)

    out = pl.pallas_call(
        kernel,
        out_shape=jax.ShapeDtypeStruct((B_pad, out_dim), x.dtype),
        grid_spec=pltpu.PrefetchScalarGridSpec(
            num_scalar_prefetch=0,
            grid=(grid_m,),
            in_specs=in_specs,
            out_specs=pl.BlockSpec((tm, out_dim), lambda i: (i, 0)),
        ),
        compiler_params=pltpu.CompilerParams(
            dimension_semantics=("parallel",),
            vmem_limit_bytes=vmem_limit,
        ),
        cost_estimate=pl.CostEstimate(
            flops=matmul_flops,
            transcendentals=transcendentals,
            bytes_accessed=bytes_accessed,
        ),
    )(x_in, t_in, c_in, *param_args)

    return out[:B] if B_pad != B else out


def init_residual_block_params(key, in_dim, out_dim, time_dim, cond_dim,
                               weight_dtype=jnp.bfloat16, dtype=jnp.float32):
    """PyTorch-default init (LayerNorm ones/zeros; Linear U(+-1/sqrt(fan_in))).

    Linear weights are created in the (fan_in, fan_out) layout (no runtime
    transpose) and stored in bf16 so the MXU runs at full bf16 rate with f32
    accumulation.  LayerNorm params and biases stay f32.
    """
    keys = jax.random.split(key, 6)

    def linear(k, fan_in, fan_out):
        kw, kb = jax.random.split(k)
        bound = 1.0 / (fan_in ** 0.5)
        w = jax.random.uniform(kw, (fan_in, fan_out), dtype, -bound, bound)
        b = jax.random.uniform(kb, (1, fan_out), dtype, -bound, bound)
        return w.astype(weight_dtype), b

    p = {}
    p['norm1_g'] = jnp.ones((1, in_dim), dtype)
    p['norm1_b'] = jnp.zeros((1, in_dim), dtype)
    p['lin1_w'], p['lin1_b'] = linear(keys[0], in_dim, out_dim)
    p['time_w'], p['time_b'] = linear(keys[1], time_dim, out_dim)
    p['norm2_g'] = jnp.ones((1, out_dim), dtype)
    p['norm2_b'] = jnp.zeros((1, out_dim), dtype)
    p['lin2_w'], p['lin2_b'] = linear(keys[2], out_dim, out_dim)
    p['cond_w'], p['cond_b'] = linear(keys[3], cond_dim, out_dim)
    p['norm3_g'] = jnp.ones((1, out_dim), dtype)
    p['norm3_b'] = jnp.zeros((1, out_dim), dtype)
    p['lin3_w'], p['lin3_b'] = linear(keys[4], out_dim, out_dim)
    if in_dim != out_dim:
        p['shortcut_w'], p['shortcut_b'] = linear(keys[5], in_dim, out_dim)
    return p


# --------------------------- pure-JAX references ------------------------------


def residual_block_ref_f32(x, t, cond, params):
    """Full-f32 reference (PyTorch semantics; bf16 weights upcast)."""
    f32 = jnp.float32
    W = lambda n: params[n].astype(f32)

    def ln(z, g, b):
        m = z.mean(-1, keepdims=True)
        v = ((z - m) ** 2).mean(-1, keepdims=True)
        return (z - m) / jnp.sqrt(v + 1e-5) * g + b

    sw = lambda z: z * jax.nn.sigmoid(z)

    h = sw(ln(x, params['norm1_g'], params['norm1_b'])) @ W('lin1_w') + params['lin1_b']
    h = h + sw(t) @ W('time_w') + params['time_b']
    h = sw(ln(h, params['norm2_g'], params['norm2_b'])) @ W('lin2_w') + params['lin2_b']
    h = h + sw(cond) @ W('cond_w') + params['cond_b']
    h = sw(ln(h, params['norm3_g'], params['norm3_b'])) @ W('lin3_w') + params['lin3_b']
    if 'shortcut_w' in params:
        sc = x @ W('shortcut_w') + params['shortcut_b']
    else:
        sc = x
    return h + sc


def residual_block_ref_matched(x, t, cond, params):
    """Reference matching the kernel's quantization (bf16 dot operands, f32 acc)."""
    bf = params['lin1_w'].dtype
    f32 = jnp.float32
    dot = lambda a, w: jnp.dot(a.astype(bf), w, preferred_element_type=f32)
    sw = lambda z: z * jax.nn.sigmoid(z)

    h = dot(sw(_layernorm(x, params['norm1_g'], params['norm1_b'])), params['lin1_w'])
    h = h + dot(sw(t), params['time_w']) + params['lin1_b'] + params['time_b']
    h = dot(sw(_layernorm(h, params['norm2_g'], params['norm2_b'])), params['lin2_w'])
    h = h + dot(sw(cond), params['cond_w']) + params['lin2_b'] + params['cond_b']
    h = dot(sw(_layernorm(h, params['norm3_g'], params['norm3_b'])), params['lin3_w'])
    h = h + params['lin3_b']
    if 'shortcut_w' in params:
        sc = dot(x, params['shortcut_w']) + params['shortcut_b']
    else:
        sc = x
    return h + sc


# ----------------------------------- main ------------------------------------


if __name__ == "__main__":
    key = jax.random.PRNGKey(0)
    kx, kt, kc, kp, kp2, kx3 = jax.random.split(key, 6)

    # Small, lane-friendly demo shapes (out_dim = 128 keeps stores unmasked).
    B, in_dim, out_dim, time_dim, cond_dim = 8, 64, 128, 32, 32

    x = jax.random.normal(kx, (B, in_dim), jnp.float32)
    t = jax.random.normal(kt, (B, time_dim), jnp.float32)
    cond = jax.random.normal(kc, (B, cond_dim), jnp.float32)

    # Case 1: in_dim != out_dim  -> Linear shortcut
    params = init_residual_block_params(kp, in_dim, out_dim, time_dim, cond_dim)
    y = jax.block_until_ready(residual_block_forward(x, t, cond, params))
    assert y.shape == (B, out_dim)
    y_m = residual_block_ref_matched(x, t, cond, params)
    y_f = residual_block_ref_f32(x, t, cond, params)
    assert jnp.allclose(y, y_m, atol=2e-2, rtol=2e-2), float(jnp.max(jnp.abs(y - y_m)))
    assert jnp.allclose(y, y_f, atol=1e-1, rtol=1e-1), float(jnp.max(jnp.abs(y - y_f)))

    # Case 2: in_dim == out_dim  -> Identity shortcut
    x2 = jax.random.normal(kx, (B, out_dim), jnp.float32)
    params2 = init_residual_block_params(kp2, out_dim, out_dim, time_dim, cond_dim)
    y2 = jax.block_until_ready(residual_block_forward(x2, t, cond, params2))
    y2_m = residual_block_ref_matched(x2, t, cond, params2)
    assert jnp.allclose(y2, y2_m, atol=2e-2, rtol=2e-2), float(jnp.max(jnp.abs(y2 - y2_m)))

    # Case 3: ragged, multi-tile batch (exercises padding + 2-step parallel grid).
    B3 = 40
    x3 = jax.random.normal(kx3, (B3, in_dim), jnp.float32)
    t3 = jax.random.normal(kt, (B3, time_dim), jnp.float32)
    c3 = jax.random.normal(kc, (B3, cond_dim), jnp.float32)
    y3 = jax.block_until_ready(residual_block_forward(x3, t3, c3, params))
    y3_m = residual_block_ref_matched(x3, t3, c3, params)
    assert y3.shape == (B3, out_dim)
    assert jnp.allclose(y3, y3_m, atol=2e-2, rtol=2e-2), float(jnp.max(jnp.abs(y3 - y3_m)))

    print("KERNEL_OK")
</pallas_src>

<mosaic_0001>
module attributes {stable_mosaic.version = 11 : i64} {
  func.func @_residual_block_kernel(%arg0: i32, %arg1: memref<8x64xf32, #tpu.memory_space<vmem>>, %arg2: memref<8x32xf32, #tpu.memory_space<vmem>>, %arg3: memref<8x32xf32, #tpu.memory_space<vmem>>, %arg4: memref<1x64xf32, #tpu.memory_space<vmem>>, %arg5: memref<1x64xf32, #tpu.memory_space<vmem>>, %arg6: memref<64x128xbf16, #tpu.memory_space<vmem>>, %arg7: memref<1x128xf32, #tpu.memory_space<vmem>>, %arg8: memref<32x128xbf16, #tpu.memory_space<vmem>>, %arg9: memref<1x128xf32, #tpu.memory_space<vmem>>, %arg10: memref<1x128xf32, #tpu.memory_space<vmem>>, %arg11: memref<128x128xbf16, #tpu.memory_space<vmem>>, %arg12: memref<1x128xf32, #tpu.memory_space<vmem>>, %arg13: memref<32x128xbf16, #tpu.memory_space<vmem>>, %arg14: memref<1x128xf32, #tpu.memory_space<vmem>>, %arg15: memref<1x128xf32, #tpu.memory_space<vmem>>, %arg16: memref<128x128xbf16, #tpu.memory_space<vmem>>, %arg17: memref<1x128xf32, #tpu.memory_space<vmem>>, %arg18: memref<64x128xbf16, #tpu.memory_space<vmem>>, %arg19: memref<1x128xf32, #tpu.memory_space<vmem>>, %arg20: memref<8x128xf32, #tpu.memory_space<vmem>>) attributes {dimension_semantics = [#tpu.dimension_semantics<parallel>], iteration_bounds = array<i64: 1>, scalar_prefetch = 0 : i64, scratch_operands = 0 : i64, tpu.core_type = #tpu.core_type<tc>, window_params = [{transform_indices = @transform_0, window_bounds = array<i64: 8, 64>}, {transform_indices = @transform_1, window_bounds = array<i64: 8, 32>}, {transform_indices = @transform_2, window_bounds = array<i64: 8, 32>}, {pipeline_mode = #tpu.pipeline_mode<synchronous>, transform_indices = @transform_3, window_bounds = array<i64: 1, 64>}, {pipeline_mode = #tpu.pipeline_mode<synchronous>, transform_indices = @transform_4, window_bounds = array<i64: 1, 64>}, {pipeline_mode = #tpu.pipeline_mode<synchronous>, transform_indices = @transform_5, window_bounds = array<i64: 64, 128>}, {pipeline_mode = #tpu.pipeline_mode<synchronous>, transform_indices = @transform_6, window_bounds = array<i64: 1, 128>}, {pipeline_mode = #tpu.pipeline_mode<synchronous>, transform_indices = @transform_7, window_bounds = array<i64: 32, 128>}, {pipeline_mode = #tpu.pipeline_mode<synchronous>, transform_indices = @transform_8, window_bounds = array<i64: 1, 128>}, {pipeline_mode = #tpu.pipeline_mode<synchronous>, transform_indices = @transform_9, window_bounds = array<i64: 1, 128>}, {pipeline_mode = #tpu.pipeline_mode<synchronous>, transform_indices = @transform_10, window_bounds = array<i64: 128, 128>}, {pipeline_mode = #tpu.pipeline_mode<synchronous>, transform_indices = @transform_11, window_bounds = array<i64: 1, 128>}, {pipeline_mode = #tpu.pipeline_mode<synchronous>, transform_indices = @transform_12, window_bounds = array<i64: 32, 128>}, {pipeline_mode = #tpu.pipeline_mode<synchronous>, transform_indices = @transform_13, window_bounds = array<i64: 1, 128>}, {pipeline_mode = #tpu.pipeline_mode<synchronous>, transform_indices = @transform_14, window_bounds = array<i64: 1, 128>}, {pipeline_mode = #tpu.pipeline_mode<synchronous>, transform_indices = @transform_15, window_bounds = array<i64: 128, 128>}, {pipeline_mode = #tpu.pipeline_mode<synchronous>, transform_indices = @transform_16, window_bounds = array<i64: 1, 128>}, {pipeline_mode = #tpu.pipeline_mode<synchronous>, transform_indices = @transform_17, window_bounds = array<i64: 64, 128>}, {pipeline_mode = #tpu.pipeline_mode<synchronous>, transform_indices = @transform_18, window_bounds = array<i64: 1, 128>}, {transform_indices = @transform_19, window_bounds = array<i64: 8, 128>}]} {
    %c0 = arith.constant 0 : index
    %c0_0 = arith.constant 0 : index
    %0 = vector.load %arg2[%c0, %c0_0] : memref<8x32xf32, #tpu.memory_space<vmem>>, vector<8x32xf32>
    %1 = arith.negf %0 : vector<8x32xf32>
    %2 = math.exp %1 : vector<8x32xf32>
    %cst = arith.constant 1.000000e+00 : f32
    %3 = vector.broadcast %cst : f32 to vector<8x32xf32>
    %4 = arith.addf %3, %2 : vector<8x32xf32>
    %5 = arith.divf %3, %4 : vector<8x32xf32>
    %6 = arith.mulf %0, %5 : vector<8x32xf32>
    %7 = arith.truncf %6 : vector<8x32xf32> to vector<8x32xbf16>
    %c0_1 = arith.constant 0 : index
    %c0_2 = arith.constant 0 : index
    %8 = vector.load %arg8[%c0_1, %c0_2] : memref<32x128xbf16, #tpu.memory_space<vmem>>, vector<32x128xbf16>
    %cst_3 = arith.constant dense<0.000000e+00> : vector<8x128xf32>
    %9 = tpu.matmul %7, %8, %cst_3 {dimension_numbers = #tpu.dot_dimension_numbers<[1], [0], [0], [1], [0, 0, 1, 1], [], []>} : vector<8x32xbf16>, vector<32x128xbf16>, vector<8x128xf32> -> vector<8x128xf32>
    %c0_4 = arith.constant 0 : index
    %c0_5 = arith.constant 0 : index
    %10 = vector.load %arg3[%c0_4, %c0_5] : memref<8x32xf32, #tpu.memory_space<vmem>>, vector<8x32xf32>
    %11 = arith.negf %10 : vector<8x32xf32>
    %12 = math.exp %11 : vector<8x32xf32>
    %cst_6 = arith.constant 1.000000e+00 : f32
    %13 = vector.broadcast %cst_6 : f32 to vector<8x32xf32>
    %14 = arith.addf %13, %12 : vector<8x32xf32>
    %15 = arith.divf %13, %14 : vector<8x32xf32>
    %16 = arith.mulf %10, %15 : vector<8x32xf32>
    %17 = arith.truncf %16 : vector<8x32xf32> to vector<8x32xbf16>
    %c0_7 = arith.constant 0 : index
    %c0_8 = arith.constant 0 : index
    %18 = vector.load %arg13[%c0_7, %c0_8] : memref<32x128xbf16, #tpu.memory_space<vmem>>, vector<32x128xbf16>
    %cst_9 = arith.constant dense<0.000000e+00> : vector<8x128xf32>
    %19 = tpu.matmul %17, %18, %cst_9 {dimension_numbers = #tpu.dot_dimension_numbers<[1], [0], [0], [1], [0, 0, 1, 1], [], []>} : vector<8x32xbf16>, vector<32x128xbf16>, vector<8x128xf32> -> vector<8x128xf32>
    %c0_10 = arith.constant 0 : index
    %c0_11 = arith.constant 0 : index
    %20 = vector.load %arg1[%c0_10, %c0_11] : memref<8x64xf32, #tpu.memory_space<vmem>>, vector<8x64xf32>
    %c0_12 = arith.constant 0 : index
    %c0_13 = arith.constant 0 : index
    %21 = vector.load %arg4[%c0_12, %c0_13] : memref<1x64xf32, #tpu.memory_space<vmem>>, vector<1x64xf32>
    %c0_14 = arith.constant 0 : index
    %c0_15 = arith.constant 0 : index
    %22 = vector.load %arg5[%c0_14, %c0_15] : memref<1x64xf32, #tpu.memory_space<vmem>>, vector<1x64xf32>
    %cst_16 = arith.constant dense<0.000000e+00> : vector<8xf32>
    %23 = vector.multi_reduction <add>, %20, %cst_16 [1] : vector<8x64xf32> to vector<8xf32>
    %24 = vector.shape_cast %23 : vector<8xf32> to vector<8x1xf32>
    %cst_17 = arith.constant 6.400000e+01 : f32
    %25 = vector.broadcast %cst_17 : f32 to vector<8x1xf32>
    %26 = arith.divf %24, %25 : vector<8x1xf32>
    %27 = arith.mulf %20, %20 : vector<8x64xf32>
    %cst_18 = arith.constant dense<0.000000e+00> : vector<8xf32>
    %28 = vector.multi_reduction <add>, %27, %cst_18 [1] : vector<8x64xf32> to vector<8xf32>
    %29 = vector.shape_cast %28 : vector<8xf32> to vector<8x1xf32>
    %cst_19 = arith.constant 6.400000e+01 : f32
    %30 = vector.broadcast %cst_19 : f32 to vector<8x1xf32>
    %31 = arith.divf %29, %30 : vector<8x1xf32>
    %32 = arith.mulf %26, %26 : vector<8x1xf32>
    %33 = arith.subf %31, %32 : vector<8x1xf32>
    %34 = vector.broadcast %26 : vector<8x1xf32> to vector<8x64xf32>
    %35 = arith.subf %20, %34 : vector<8x64xf32>
    %cst_20 = arith.constant 9.99999974E-6 : f32
    %36 = vector.broadcast %cst_20 : f32 to vector<8x1xf32>
    %37 = arith.addf %33, %36 : vector<8x1xf32>
    %38 = math.rsqrt %37 : vector<8x1xf32>
    %39 = vector.broadcast %38 : vector<8x1xf32> to vector<8x64xf32>
    %40 = arith.mulf %35, %39 : vector<8x64xf32>
    %41 = vector.broadcast %21 : vector<1x64xf32> to vector<8x64xf32>
    %42 = arith.mulf %40, %41 : vector<8x64xf32>
    %43 = vector.broadcast %22 : vector<1x64xf32> to vector<8x64xf32>
    %44 = arith.addf %42, %43 : vector<8x64xf32>
    %45 = arith.negf %44 : vector<8x64xf32>
    %46 = math.exp %45 : vector<8x64xf32>
    %cst_21 = arith.constant 1.000000e+00 : f32
    %47 = vector.broadcast %cst_21 : f32 to vector<8x64xf32>
    %48 = arith.addf %47, %46 : vector<8x64xf32>
    %49 = arith.divf %47, %48 : vector<8x64xf32>
    %50 = arith.mulf %44, %49 : vector<8x64xf32>
    %51 = arith.truncf %50 : vector<8x64xf32> to vector<8x64xbf16>
    %c0_22 = arith.constant 0 : index
    %c0_23 = arith.constant 0 : index
    %52 = vector.load %arg6[%c0_22, %c0_23] : memref<64x128xbf16, #tpu.memory_space<vmem>>, vector<64x128xbf16>
    %cst_24 = arith.constant dense<0.000000e+00> : vector<8x128xf32>
    %53 = tpu.matmul %51, %52, %cst_24 {dimension_numbers = #tpu.dot_dimension_numbers<[1], [0], [0], [1], [0, 0, 1, 1], [], []>} : vector<8x64xbf16>, vector<64x128xbf16>, vector<8x128xf32> -> vector<8x128xf32>
    %54 = arith.addf %53, %9 : vector<8x128xf32>
    %c0_25 = arith.constant 0 : index
    %c0_26 = arith.constant 0 : index
    %55 = vector.load %arg7[%c0_25, %c0_26] : memref<1x128xf32, #tpu.memory_space<vmem>>, vector<1x128xf32>
    %56 = vector.broadcast %55 : vector<1x128xf32> to vector<8x128xf32>
    %57 = arith.addf %54, %56 : vector<8x128xf32>
    %c0_27 = arith.constant 0 : index
    %c0_28 = arith.constant 0 : index
    %58 = vector.load %arg9[%c0_27, %c0_28] : memref<1x128xf32, #tpu.memory_space<vmem>>, vector<1x128xf32>
    %c0_29 = arith.constant 0 : index
    %c0_30 = arith.constant 0 : index
    %59 = vector.load %arg10[%c0_29, %c0_30] : memref<1x128xf32, #tpu.memory_space<vmem>>, vector<1x128xf32>
    %cst_31 = arith.constant dense<0.000000e+00> : vector<8xf32>
    %60 = vector.multi_reduction <add>, %57, %cst_31 [1] : vector<8x128xf32> to vector<8xf32>
    %61 = vector.shape_cast %60 : vector<8xf32> to vector<8x1xf32>
    %cst_32 = arith.constant 1.280000e+02 : f32
    %62 = vector.broadcast %cst_32 : f32 to vector<8x1xf32>
    %63 = arith.divf %61, %62 : vector<8x1xf32>
    %64 = arith.mulf %57, %57 : vector<8x128xf32>
    %cst_33 = arith.constant dense<0.000000e+00> : vector<8xf32>
    %65 = vector.multi_reduction <add>, %64, %cst_33 [1] : vector<8x128xf32> to vector<8xf32>
    %66 = vector.shape_cast %65 : vector<8xf32> to vector<8x1xf32>
    %cst_34 = arith.constant 1.280000e+02 : f32
    %67 = vector.broadcast %cst_34 : f32 to vector<8x1xf32>
    %68 = arith.divf %66, %67 : vector<8x1xf32>
    %69 = arith.mulf %63, %63 : vector<8x1xf32>
    %70 = arith.subf %68, %69 : vector<8x1xf32>
    %71 = vector.broadcast %63 : vector<8x1xf32> to vector<8x128xf32>
    %72 = arith.subf %57, %71 : vector<8x128xf32>
    %cst_35 = arith.constant 9.99999974E-6 : f32
    %73 = vector.broadcast %cst_35 : f32 to vector<8x1xf32>
    %74 = arith.addf %70, %73 : vector<8x1xf32>
    %75 = math.rsqrt %74 : vector<8x1xf32>
    %76 = vector.broadcast %75 : vector<8x1xf32> to vector<8x128xf32>
    %77 = arith.mulf %72, %76 : vector<8x128xf32>
    %78 = vector.broadcast %58 : vector<1x128xf32> to vector<8x128xf32>
    %79 = arith.mulf %77, %78 : vector<8x128xf32>
    %80 = vector.broadcast %59 : vector<1x128xf32> to vector<8x128xf32>
    %81 = arith.addf %79, %80 : vector<8x128xf32>
    %82 = arith.negf %81 : vector<8x128xf32>
    %83 = math.exp %82 : vector<8x128xf32>
    %cst_36 = arith.constant 1.000000e+00 : f32
    %84 = vector.broadcast %cst_36 : f32 to vector<8x128xf32>
    %85 = arith.addf %84, %83 : vector<8x128xf32>
    %86 = arith.divf %84, %85 : vector<8x128xf32>
    %87 = arith.mulf %81, %86 : vector<8x128xf32>
    %88 = arith.truncf %87 : vector<8x128xf32> to vector<8x128xbf16>
    %c0_37 = arith.constant 0 : index
    %c0_38 = arith.constant 0 : index
    %89 = vector.load %arg11[%c0_37, %c0_38] : memref<128x128xbf16, #tpu.memory_space<vmem>>, vector<128x128xbf16>
    %cst_39 = arith.constant dense<0.000000e+00> : vector<8x128xf32>
    %90 = tpu.matmul %88, %89, %cst_39 {dimension_numbers = #tpu.dot_dimension_numbers<[1], [0], [0], [1], [0, 0, 1, 1], [], []>} : vector<8x128xbf16>, vector<128x128xbf16>, vector<8x128xf32> -> vector<8x128xf32>
    %91 = arith.addf %90, %19 : vector<8x128xf32>
    %c0_40 = arith.constant 0 : index
    %c0_41 = arith.constant 0 : index
    %92 = vector.load %arg12[%c0_40, %c0_41] : memref<1x128xf32, #tpu.memory_space<vmem>>, vector<1x128xf32>
    %93 = vector.broadcast %92 : vector<1x128xf32> to vector<8x128xf32>
    %94 = arith.addf %91, %93 : vector<8x128xf32>
    %c0_42 = arith.constant 0 : index
    %c0_43 = arith.constant 0 : index
    %95 = vector.load %arg14[%c0_42, %c0_43] : memref<1x128xf32, #tpu.memory_space<vmem>>, vector<1x128xf32>
    %c0_44 = arith.constant 0 : index
    %c0_45 = arith.constant 0 : index
    %96 = vector.load %arg15[%c0_44, %c0_45] : memref<1x128xf32, #tpu.memory_space<vmem>>, vector<1x128xf32>
    %cst_46 = arith.constant dense<0.000000e+00> : vector<8xf32>
    %97 = vector.multi_reduction <add>, %94, %cst_46 [1] : vector<8x128xf32> to vector<8xf32>
    %98 = vector.shape_cast %97 : vector<8xf32> to vector<8x1xf32>
    %cst_47 = arith.constant 1.280000e+02 : f32
    %99 = vector.broadcast %cst_47 : f32 to vector<8x1xf32>
    %100 = arith.divf %98, %99 : vector<8x1xf32>
    %101 = arith.mulf %94, %94 : vector<8x128xf32>
    %cst_48 = arith.constant dense<0.000000e+00> : vector<8xf32>
    %102 = vector.multi_reduction <add>, %101, %cst_48 [1] : vector<8x128xf32> to vector<8xf32>
    %103 = vector.shape_cast %102 : vector<8xf32> to vector<8x1xf32>
    %cst_49 = arith.constant 1.280000e+02 : f32
    %104 = vector.broadcast %cst_49 : f32 to vector<8x1xf32>
    %105 = arith.divf %103, %104 : vector<8x1xf32>
    %106 = arith.mulf %100, %100 : vector<8x1xf32>
    %107 = arith.subf %105, %106 : vector<8x1xf32>
    %108 = vector.broadcast %100 : vector<8x1xf32> to vector<8x128xf32>
    %109 = arith.subf %94, %108 : vector<8x128xf32>
    %cst_50 = arith.constant 9.99999974E-6 : f32
    %110 = vector.broadcast %cst_50 : f32 to vector<8x1xf32>
    %111 = arith.addf %107, %110 : vector<8x1xf32>
    %112 = math.rsqrt %111 : vector<8x1xf32>
    %113 = vector.broadcast %112 : vector<8x1xf32> to vector<8x128xf32>
    %114 = arith.mulf %109, %113 : vector<8x128xf32>
    %115 = vector.broadcast %95 : vector<1x128xf32> to vector<8x128xf32>
    %116 = arith.mulf %114, %115 : vector<8x128xf32>
    %117 = vector.broadcast %96 : vector<1x128xf32> to vector<8x128xf32>
    %118 = arith.addf %116, %117 : vector<8x128xf32>
    %119 = arith.negf %118 : vector<8x128xf32>
    %120 = math.exp %119 : vector<8x128xf32>
    %cst_51 = arith.constant 1.000000e+00 : f32
    %121 = vector.broadcast %cst_51 : f32 to vector<8x128xf32>
    %122 = arith.addf %121, %120 : vector<8x128xf32>
    %123 = arith.divf %121, %122 : vector<8x128xf32>
    %124 = arith.mulf %118, %123 : vector<8x128xf32>
    %125 = arith.truncf %124 : vector<8x128xf32> to vector<8x128xbf16>
    %c0_52 = arith.constant 0 : index
    %c0_53 = arith.constant 0 : index
    %126 = vector.load %arg16[%c0_52, %c0_53] : memref<128x128xbf16, #tpu.memory_space<vmem>>, vector<128x128xbf16>
    %cst_54 = arith.constant dense<0.000000e+00> : vector<8x128xf32>
    %127 = tpu.matmul %125, %126, %cst_54 {dimension_numbers = #tpu.dot_dimension_numbers<[1], [0], [0], [1], [0, 0, 1, 1], [], []>} : vector<8x128xbf16>, vector<128x128xbf16>, vector<8x128xf32> -> vector<8x128xf32>
    %c0_55 = arith.constant 0 : index
    %c0_56 = arith.constant 0 : index
    %128 = vector.load %arg17[%c0_55, %c0_56] : memref<1x128xf32, #tpu.memory_space<vmem>>, vector<1x128xf32>
    %129 = vector.broadcast %128 : vector<1x128xf32> to vector<8x128xf32>
    %130 = arith.addf %127, %129 : vector<8x128xf32>
    %c0_57 = arith.constant 0 : index
    %c0_58 = arith.constant 0 : index
    %131 = vector.load %arg1[%c0_57, %c0_58] : memref<8x64xf32, #tpu.memory_space<vmem>>, vector<8x64xf32>
    %132 = arith.truncf %131 : vector<8x64xf32> to vector<8x64xbf16>
    %c0_59 = arith.constant 0 : index
    %c0_60 = arith.constant 0 : index
    %133 = vector.load %arg18[%c0_59, %c0_60] : memref<64x128xbf16, #tpu.memory_space<vmem>>, vector<64x128xbf16>
    %cst_61 = arith.constant dense<0.000000e+00> : vector<8x128xf32>
    %134 = tpu.matmul %132, %133, %cst_61 {dimension_numbers = #tpu.dot_dimension_numbers<[1], [0], [0], [1], [0, 0, 1, 1], [], []>} : vector<8x64xbf16>, vector<64x128xbf16>, vector<8x128xf32> -> vector<8x128xf32>
    %c0_62 = arith.constant 0 : index
    %c0_63 = arith.constant 0 : index
    %135 = vector.load %arg19[%c0_62, %c0_63] : memref<1x128xf32, #tpu.memory_space<vmem>>, vector<1x128xf32>
    %136 = vector.broadcast %135 : vector<1x128xf32> to vector<8x128xf32>
    %137 = arith.addf %134, %136 : vector<8x128xf32>
    %138 = arith.addf %130, %137 : vector<8x128xf32>
    %c0_64 = arith.constant 0 : index
    %c0_65 = arith.constant 0 : index
    %139 = vector.load %arg20[%c0_64, %c0_65] : memref<8x128xf32, #tpu.memory_space<vmem>>, vector<8x128xf32>
    tpu.vector_store %arg20[%c0_64, %c0_65], %138 {strides = array<i32>} : memref<8x128xf32, #tpu.memory_space<vmem>>, vector<8x128xf32>,
    return
  }
  func.func @transform_0(%arg0: i32) -> (i32, i32) {
    %c0_i32 = arith.constant 0 : i32
    %c0_i32_0 = arith.constant 0 : i32
    return %arg0, %c0_i32 : i32, i32
  }
  func.func @transform_1(%arg0: i32) -> (i32, i32) {
    %c0_i32 = arith.constant 0 : i32
    %c0_i32_0 = arith.constant 0 : i32
    return %arg0, %c0_i32 : i32, i32
  }
  func.func @transform_2(%arg0: i32) -> (i32, i32) {
    %c0_i32 = arith.constant 0 : i32
    %c0_i32_0 = arith.constant 0 : i32
    return %arg0, %c0_i32 : i32, i32
  }
  func.func @transform_3(%arg0: i32) -> (i32, i32) {
    %c0_i32 = arith.constant 0 : i32
    %c0_i32_0 = arith.constant 0 : i32
    %c0_i32_1 = arith.constant 0 : i32
    return %c0_i32, %c0_i32_0 : i32, i32
  }
  func.func @transform_4(%arg0: i32) -> (i32, i32) {
    %c0_i32 = arith.constant 0 : i32
    %c0_i32_0 = arith.constant 0 : i32
    %c0_i32_1 = arith.constant 0 : i32
    return %c0_i32, %c0_i32_0 : i32, i32
  }
  func.func @transform_5(%arg0: i32) -> (i32, i32) {
    %c0_i32 = arith.constant 0 : i32
    %c0_i32_0 = arith.constant 0 : i32
    %c0_i32_1 = arith.constant 0 : i32
    return %c0_i32, %c0_i32_0 : i32, i32
  }
  func.func @transform_6(%arg0: i32) -> (i32, i32) {
    %c0_i32 = arith.constant 0 : i32
    %c0_i32_0 = arith.constant 0 : i32
    %c0_i32_1 = arith.constant 0 : i32
    return %c0_i32, %c0_i32_0 : i32, i32
  }
  func.func @transform_7(%arg0: i32) -> (i32, i32) {
    %c0_i32 = arith.constant 0 : i32
    %c0_i32_0 = arith.constant 0 : i32
    %c0_i32_1 = arith.constant 0 : i32
    return %c0_i32, %c0_i32_0 : i32, i32
  }
  func.func @transform_8(%arg0: i32) -> (i32, i32) {
    %c0_i32 = arith.constant 0 : i32
    %c0_i32_0 = arith.constant 0 : i32
    %c0_i32_1 = arith.constant 0 : i32
    return %c0_i32, %c0_i32_0 : i32, i32
  }
  func.func @transform_9(%arg0: i32) -> (i32, i32) {
    %c0_i32 = arith.constant 0 : i32
    %c0_i32_0 = arith.constant 0 : i32
    %c0_i32_1 = arith.constant 0 : i32
    return %c0_i32, %c0_i32_0 : i32, i32
  }
  func.func @transform_10(%arg0: i32) -> (i32, i32) {
    %c0_i32 = arith.constant 0 : i32
    %c0_i32_0 = arith.constant 0 : i32
    %c0_i32_1 = arith.constant 0 : i32
    return %c0_i32, %c0_i32_0 : i32, i32
  }
  func.func @transform_11(%arg0: i32) -> (i32, i32) {
    %c0_i32 = arith.constant 0 : i32
    %c0_i32_0 = arith.constant 0 : i32
    %c0_i32_1 = arith.constant 0 : i32
    return %c0_i32, %c0_i32_0 : i32, i32
  }
  func.func @transform_12(%arg0: i32) -> (i32, i32) {
    %c0_i32 = arith.constant 0 : i32
    %c0_i32_0 = arith.constant 0 : i32
    %c0_i32_1 = arith.constant 0 : i32
    return %c0_i32, %c0_i32_0 : i32, i32
  }
  func.func @transform_13(%arg0: i32) -> (i32, i32) {
    %c0_i32 = arith.constant 0 : i32
    %c0_i32_0 = arith.constant 0 : i32
    %c0_i32_1 = arith.constant 0 : i32
    return %c0_i32, %c0_i32_0 : i32, i32
  }
  func.func @transform_14(%arg0: i32) -> (i32, i32) {
    %c0_i32 = arith.constant 0 : i32
    %c0_i32_0 = arith.constant 0 : i32
    %c0_i32_1 = arith.constant 0 : i32
    return %c0_i32, %c0_i32_0 : i32, i32
  }
  func.func @transform_15(%arg0: i32) -> (i32, i32) {
    %c0_i32 = arith.constant 0 : i32
    %c0_i32_0 = arith.constant 0 : i32
    %c0_i32_1 = arith.constant 0 : i32
    return %c0_i32, %c0_i32_0 : i32, i32
  }
  func.func @transform_16(%arg0: i32) -> (i32, i32) {
    %c0_i32 = arith.constant 0 : i32
    %c0_i32_0 = arith.constant 0 : i32
    %c0_i32_1 = arith.constant 0 : i32
    return %c0_i32, %c0_i32_0 : i32, i32
  }
  func.func @transform_17(%arg0: i32) -> (i32, i32) {
    %c0_i32 = arith.constant 0 : i32
    %c0_i32_0 = arith.constant 0 : i32
    %c0_i32_1 = arith.constant 0 : i32
    return %c0_i32, %c0_i32_0 : i32, i32
  }
  func.func @transform_18(%arg0: i32) -> (i32, i32) {
    %c0_i32 = arith.constant 0 : i32
    %c0_i32_0 = arith.constant 0 : i32
    %c0_i32_1 = arith.constant 0 : i32
    return %c0_i32, %c0_i32_0 : i32, i32
  }
  func.func @transform_19(%arg0: i32) -> (i32, i32) {
    %c0_i32 = arith.constant 0 : i32
    %c0_i32_0 = arith.constant 0 : i32
    return %arg0, %c0_i32 : i32, i32
  }
}

</mosaic_0001>

<bundles_post_ra>
// kernel: tpu_custom_call.1
= control target key start
LH: loop header
LB: loop body
LE: loop exit
PB: predicated region body
PF: predicated region fallthrough
CT: control target
= control target key end

     0   :  { %s1529_s0 = inlined_call_operand.hbm [shape: f32[8,64], index: 0, kind: input, shape index: {}]   ;;  %s1530_s1 = inlined_call_operand.hbm [shape: f32[8,32], index: 1, kind: input, shape index: {}]   ;;  %s1531_s2 = inlined_call_operand.hbm [shape: f32[8,32], index: 2, kind: input, shape index: {}]   ;;  %s1532_s3 = inlined_call_operand.vmem [shape: f32[1,64], index: 3, kind: input, shape index: {}]   ;;  %s1533_s4 = inlined_call_operand.vmem [shape: f32[1,64], index: 4, kind: input, shape index: {}]   ;;  %s1534_s5 = inlined_call_operand.hbm [shape: bf16[64,128], index: 5, kind: input, shape index: {}]   ;;  %s1535_s6 = inlined_call_operand.vmem [shape: f32[1,128], index: 6, kind: input, shape index: {}]   ;;  %s1536_s7 = inlined_call_operand.hbm [shape: bf16[32,128], index: 7, kind: input, shape index: {}]   ;;  %s1537_s8 = inlined_call_operand.vmem [shape: f32[1,128], index: 8, kind: input, shape index: {}]   ;;  %s1538_s9 = inlined_call_operand.vmem [shape: f32[1,128], index: 9, kind: input, shape index: {}]   ;;  %s1539_s10 = inlined_call_operand.hbm [shape: bf16[128,128], index: 10, kind: input, shape index: {}]   ;;  %s1540_s11 = inlined_call_operand.hbm [shape: f32[1,128], index: 11, kind: input, shape index: {}]   ;;  %s1541_s12 = inlined_call_operand.vmem [shape: bf16[32,128], index: 12, kind: input, shape index: {}]   ;;  %s1542_s13 = inlined_call_operand.vmem [shape: f32[1,128], index: 13, kind: input, shape index: {}]   ;;  %s1543_s14 = inlined_call_operand.vmem [shape: f32[1,128], index: 14, kind: input, shape index: {}]   ;;  %s1544_s15 = inlined_call_operand.hbm [shape: bf16[128,128], index: 15, kind: input, shape index: {}]   ;;  %s1545_s16 = inlined_call_operand.vmem [shape: f32[1,128], index: 16, kind: input, shape index: {}]   ;;  %s1546_s17 = inlined_call_operand.hbm [shape: bf16[64,128], index: 17, kind: input, shape index: {}]   ;;  %s1547_s18 = inlined_call_operand.vmem [shape: f32[1,128], index: 18, kind: input, shape index: {}]   ;;  %s1548_s19 = inlined_call_operand.hbm [shape: f32[8,128], index: 19, kind: output, shape index: {}]  }
   0x1   :  { %1549 = sst [smem:[#allocation24_spill]] %s1529_s0 }
   0x2   :  { %1550 = sst [smem:[#allocation25_spill]] %s1530_s1 }
   0x3   :  { %1551 = sst [smem:[#allocation26_spill]] %s1531_s2 }
   0x4   :  { %1552 = sst [smem:[#allocation27_spill]] %s1532_s3 }
   0x5   :  { %24 = vsyncpa [#allocation3], 0 }
   0x6   :  { %25 = vsyncpa [#allocation6], 0 }
   0x7   :  { %26 = vsyncpa [#allocation9], 0 }
   0x8   :  { %27 = vsyncpa [#allocation12], 0 }
   0x9   :  { %28 = vsyncpa [#allocation15], 0 }
   0xa   :  { %29 = vsyncpa [#allocation4], 0  ;;  %s1283_s0 = smov [#allocation5]   ;;  %s1284_s20 = smov [#allocation8]  }
   0xb   :  { %s46_s30 = sshll.u32 %s1283_s0, 4  ;;  %s69_s21 = sshll.u32 %s1284_s20, 4  ;;  %s47_s30 = int_to_ptr.vmem [resolvable:$true] %s46_s30  ;;  %s70_s21 = int_to_ptr.vmem [resolvable:$true] %s69_s21 }
   0xc   :  { %s1079_s1 = scalar_lea.vmem %s47_s30, 128  ;;  %p1084_p1 = scmp.lt.s32.totalorder %s47_s30, %s47_s30 }
   0xd   :  { %p1080_p0 = scmp.ne.s32.totalorder %s47_s30, %s1079_s1  ;;  %p1085_p2 = scmp.lt.s32.totalorder %s1079_s1, %s1079_s1 }
   0xf   :  { %p1086_p3 = por %p1085_p2, %p1084_p1 }
  0x11   :  { %p1087_p4 = pnand %p1086_p3, %p1080_p0 }
  0x13   :  { %1090 = shalt.err (!%p1087_p4)
}
  0x14   :  { %s1553_s23 = sld [smem:[#allocation25_spill]]  ;;  %s1099_s24 = scalar_lea.vmem %s70_s21, 512 }
  0x15   :  { %p1100_p5 = scmp.ne.s32.totalorder %s70_s21, %s1099_s24  ;;  %p1104_p6 = scmp.lt.s32.totalorder %s70_s21, %s70_s21 }
  0x16   :  { %p1105_p7 = scmp.lt.s32.totalorder %s1099_s24, %s1099_s24 }
  0x18   :  { %p1106_p8 = por %p1105_p7, %p1104_p6 }
  0x1a   :  { %49 = dma.hbm_to_vmem [thread:$0]  %s1553_s23, 128, %s47_s30, [#allocation6]  }
  0x1b   :  { %p1107_p9 = pnand %p1106_p8, %p1100_p5 }
  0x1d   :  { %1110 = shalt.err (!%p1107_p9)
}
  0x1e   :  { %s1285_s25 = smov 64   ;;  %s1286_s3 = smov 4  }
  0x1f   :  { %75 = dma.hbm_to_vmem [thread:$0]  %s1534_s5, 512, %s70_s21, [#allocation9], %s1285_s25, %s1285_s25, %s1286_s3  }
  0x20   :  { %s1287_s28 = smov [#allocation11]   ;;  %s1288_s0 = smov [#allocation14]  }
  0x21   :  { %s99_s29 = sshll.u32 %s1287_s28, 4  ;;  %s127_s30 = sshll.u32 %s1288_s0, 4  ;;  %s100_s29 = int_to_ptr.vmem [resolvable:$true] %s99_s29  ;;  %s128_s30 = int_to_ptr.vmem [resolvable:$true] %s127_s30 }
  0x22   :  { %s1119_s20 = scalar_lea.vmem %s100_s29, 1024  ;;  %p1124_p11 = scmp.lt.s32.totalorder %s100_s29, %s100_s29 }
  0x23   :  { %p1120_p10 = scmp.ne.s32.totalorder %s100_s29, %s1119_s20  ;;  %p1125_p12 = scmp.lt.s32.totalorder %s1119_s20, %s1119_s20 }
  0x25   :  { %p1126_p13 = por %p1125_p12, %p1124_p11 }
  0x27   :  { %p1127_p0 = pnand %p1126_p13, %p1120_p10 }
  0x29   :  { %1130 = shalt.err (!%p1127_p0)
}
  0x2a   :  { %105 = dma.hbm_to_vmem [thread:$0]  %s1539_s10, 1024, %s100_s29, [#allocation12], %s1285_s25, %s1285_s25, %s1286_s3  }
  0x2b   :  { %s1139_s5 = scalar_lea.vmem %s128_s30, 1024  ;;  %p1144_p2 = scmp.lt.s32.totalorder %s128_s30, %s128_s30 }
  0x2c   :  { %p1140_p1 = scmp.ne.s32.totalorder %s128_s30, %s1139_s5  ;;  %p1145_p3 = scmp.lt.s32.totalorder %s1139_s5, %s1139_s5 }
  0x2e   :  { %p1146_p4 = por %p1145_p3, %p1144_p2 }
  0x30   :  { %p1147_p5 = pnand %p1146_p4, %p1140_p1 }
  0x32   :  { %1150 = shalt.err (!%p1147_p5)
}
  0x33   :  { %133 = dma.hbm_to_vmem [thread:$0]  %s1544_s15, 1024, %s128_s30, [#allocation15], %s1285_s25, %s1285_s25, %s1286_s3  }
  0x34   :  { %s1289_s23 = smov [#allocation2]   ;;  %s1290_s26 = smov [#allocation7]  }
  0x35   :  { %s36_s24 = sshll.u32 %s1289_s23, 4  ;;  %s56_s27 = sshll.u32 %s1290_s26, 4  ;;  %s37_s24 = int_to_ptr.vmem [resolvable:$true] %s36_s24  ;;  %s57_s27 = int_to_ptr.vmem [resolvable:$true] %s56_s27 }
  0x36   :  { %s1159_s10 = scalar_lea.vmem %s37_s24, 128  ;;  %p1164_p7 = scmp.lt.s32.totalorder %s37_s24, %s37_s24 }
  0x37   :  { %p1160_p6 = scmp.ne.s32.totalorder %s37_s24, %s1159_s10  ;;  %p1165_p8 = scmp.lt.s32.totalorder %s1159_s10, %s1159_s10 }
  0x39   :  { %p1166_p9 = por %p1165_p8, %p1164_p7 }
  0x3b   :  { %p1167_p10 = pnand %p1166_p9, %p1160_p6 }
  0x3d   :  { %1170 = shalt.err (!%p1167_p10)
}
  0x3e   :  { %s1554_s0 = sld [smem:[#allocation24_spill]]  ;;  %s1179_s20 = scalar_lea.vmem %s57_s27, 128 }
  0x3f   :  { %p1180_p11 = scmp.ne.s32.totalorder %s57_s27, %s1179_s20  ;;  %p1184_p12 = scmp.lt.s32.totalorder %s57_s27, %s57_s27 }
  0x40   :  { %p1185_p13 = scmp.lt.s32.totalorder %s1179_s20, %s1179_s20 }
  0x42   :  { %p1186_p0 = por %p1185_p13, %p1184_p12 }
  0x44   :  { %39 = dma.hbm_to_vmem [thread:$0]  %s1554_s0, 128, %s37_s24, [#allocation3]  }
  0x45   :  { %p1187_p1 = pnand %p1186_p0, %p1180_p11 }
  0x47   :  { %1190 = shalt.err (!%p1187_p1)
}
  0x48   :  { %s1555_s1 = sld [smem:[#allocation26_spill]]  ;;  %s1291_s22 = smov [#allocation10]  }
  0x49   :  { %s83_s5 = sshll.u32 %s1291_s22, 4  ;;  %s1292_s21 = smov [#allocation13]   ;;  %s84_s5 = int_to_ptr.vmem [resolvable:$true] %s83_s5 }
  0x4a   :  { %s112_s2 = sshll.u32 %s1292_s21, 4  ;;  %s1199_s23 = scalar_lea.vmem %s84_s5, 256  ;;  %s113_s2 = int_to_ptr.vmem [resolvable:$true] %s112_s2 }
  0x4b   :  { %p1200_p2 = scmp.ne.s32.totalorder %s84_s5, %s1199_s23  ;;  %p1204_p3 = scmp.lt.s32.totalorder %s84_s5, %s84_s5 }
  0x4c   :  { %p1205_p4 = scmp.lt.s32.totalorder %s1199_s23, %s1199_s23 }
  0x4e   :  { %59 = dma.hbm_to_vmem [thread:$0]  %s1555_s1, 128, %s57_s27, [#allocation6]  }
  0x4f   :  { %p1206_p5 = por %p1205_p4, %p1204_p3 }
  0x51   :  { %p1207_p6 = pnand %p1206_p5, %p1200_p2 }
  0x53   :  { %1210 = shalt.err (!%p1207_p6)
}
  0x54   :  { %89 = dma.hbm_to_vmem [thread:$0]  %s1536_s7, 256, %s84_s5, [#allocation9], %s1285_s25, %s1285_s25, %s1286_s3  }
  0x55   :  { %s1219_s27 = scalar_lea.vmem %s113_s2, 16  ;;  %s1223_s10 = scalar_lea.vmem %s113_s2, 32 }
  0x56   :  { %p1220_p7 = scmp.ne.s32.totalorder %s113_s2, %s1219_s27  ;;  %p1224_p8 = scmp.lt.s32.totalorder %s113_s2, %s113_s2 }
  0x57   :  { %p1225_p9 = scmp.lt.s32.totalorder %s1223_s10, %s1219_s27 }
  0x59   :  { %p1226_p10 = por %p1225_p9, %p1224_p8 }
  0x5b   :  { %p1227_p11 = pnand %p1226_p10, %p1220_p7 }
  0x5d   :  { %1230 = shalt.err (!%p1227_p11)
}
  0x5e   :  { %115 = dma.hbm_to_vmem [thread:$0]  %s1540_s11, 16, %s113_s2, [#allocation12]  }
  0x5f   :  { %s1293_s0 = smov [#allocation16]  }
  0x60   :  { %s141_s20 = sshll.u32 %s1293_s0, 4  ;;  %s142_s20 = int_to_ptr.vmem [resolvable:$true] %s141_s20 }
  0x61   :  { %s1239_s15 = scalar_lea.vmem %s142_s20, 512  ;;  %p1244_p13 = scmp.lt.s32.totalorder %s142_s20, %s142_s20 }
  0x62   :  { %p1240_p12 = scmp.ne.s32.totalorder %s142_s20, %s1239_s15  ;;  %p1245_p0 = scmp.lt.s32.totalorder %s1239_s15, %s1239_s15 }
  0x64   :  { %p1246_p1 = por %p1245_p0, %p1244_p13 }
  0x66   :  { %p1247_p2 = pnand %p1246_p1, %p1240_p12 }
  0x68   :  { %1250 = shalt.err (!%p1247_p2)
}
  0x69   :  { %147 = dma.hbm_to_vmem [thread:$0]  %s1546_s17, 512, %s142_s20, [#allocation15], %s1285_s25, %s1285_s25, %s1286_s3  }
  0x6a   :  { %1271 = dma.done.wait [#allocation3], 128  }
  0x6b   :  { %1272 = vsyncadd [#allocation3], 4294967168 }
  0x6c   :  { %1273 = dma.done.wait [#allocation6], 256  }
  0x6d   :  { %1274 = vsyncadd [#allocation6], 4294967040 }
  0x6e   :  { %1275 = dma.done.wait [#allocation9], 768  }
  0x6f   :  { %1276 = vsyncadd [#allocation9], 4294966528 }
  0x70   :  { %1277 = dma.done.wait [#allocation12], 1040  }
  0x71   :  { %1278 = vsyncadd [#allocation12], 4294966256 }
  0x72   :  { %1279 = dma.done.wait [#allocation15], 1536  }
  0x73   :  { %1280 = vsyncadd [#allocation15], 4294965760  ;;  %vm318_vm0 = vcmask 523264   ;;  %v1439_v0 = vld [vmem:[#allocation2] sm:$0xff]  ;;  %v178_v4 = vld [vmem:[#allocation5] sm:$0xff]  ;;  %v1294_v8 = vmov 0.0  }
  0x74   :  { %v319_v1 = vsel %vm318_vm0, %v1439_v0, 0.0  ;;  %v324_v2 = vmul.f32 %v1439_v0, %v1439_v0  ;;  %v842_v5 = vmul.f32 -1.442695, %v178_v4  ;;  %v1017_v7 = vld [vmem:[#allocation10 + $0x8] sm:$0xff]   ;;  %923 = vmatprep.subr.bf16.mxu0 %v1294_v8  ;;  %vm1295_vm1 = vmmov 0   ;;  %v1018_v10 = vld [vmem:[#allocation10] sm:$0xff]   ;;  %931 = vmatprep.subr.bf16.mxu1 %v1294_v8 }
  0x75   :  { %320 = vadd.xlane.f32.xlu0 %v319_v1  ;;  %927 = vmatprep.mubr.msk.bf16.mxu0 %vm1295_vm1, %v1294_v8  ;;  %vm203_vm2 = vcmask 261120   ;;  %v1019_v13 = vld [vmem:[#allocation8 + $0x18] sm:$0xff]   ;;  %v1020_v15 = vld [vmem:[#allocation8 + $0x10] sm:$0xff]   ;;  %v1021_v16 = vld [vmem:[#allocation8 + $0x8] sm:$0xff]   ;;  %s1556_s25 = sld [smem:[#allocation27_spill]]  ;;  %s1296_s0 = smov [#allocation17]  }
  0x76   :  { %v325_v3 = vsel %vm318_vm0, %v324_v2, 0.0  ;;  %1045 = vpow2.f32 %v842_v5  ;;  %924 = vmatpush3.bf16.msra.mxu0 %v1017_v7  ;;  %935 = vmatprep.mubr.msk.bf16.mxu1 %vm1295_vm1, %v1294_v8  ;;  %v1022_v17 = vld [vmem:[#allocation8] sm:$0xff]   ;;  %v851_v29 = vld [vmem:[%s1533_s4] ss:$0 sm:$0xff]  ;;  %v1025_v58 = vld [vmem:[#allocation11 + $0x38] sm:$0xff]   ;;  %s829_s20 = sshll.u32 %s1296_s0, 4  ;;  %s830_s20 = int_to_ptr.vmem [resolvable:$true] %s829_s20 }
  0x77   :  { %925 = vmatprep.subr.bf16.mxu0 %v1294_v8  ;;  %v858_v43 = vld [vmem:[%s1535_s6] ss:$0 sm:$0xff]  ;;  %v1023_v54 = vld [vmem:[%s1541_s12 + $0x8] sm:$0xff]   ;;  %v1028_v62 = vld [vmem:[#allocation11 + $0x20] sm:$0xff]   ;;  %s1251_s15 = scalar_lea.vmem %s830_s20, 128  ;;  %p1256_p4 = scmp.lt.s32.totalorder %s830_s20, %s830_s20 }
  0x78   :  { %v247_v50 = vld [vmem:[#allocation7] sm:$0xff]  ;;  %932 = vmatpush3.bf16.msra.mxu1 %v1023_v54  ;;  %v1026_v60 = vld [vmem:[#allocation11 + $0x30] sm:$0xff]   ;;  %v1029_v63 = vld [vmem:[#allocation11 + $0x18] sm:$0xff]   ;;  %p1252_p3 = scmp.ne.s32.totalorder %s830_s20, %s1251_s15  ;;  %p1257_p5 = scmp.lt.s32.totalorder %s1251_s15, %s1251_s15 }
  0x79   :  { %326 = vadd.xlane.f32.xlu0 %v325_v3  ;;  %v846_v51 = vmul.f32 -1.442695, %v247_v50  ;;  %v1024_v55 = vld [vmem:[%s1541_s12] sm:$0xff]   ;;  %933 = vmatprep.subr.bf16.mxu1 %v1294_v8  ;;  %v1030_v1 = vld [vmem:[#allocation11 + $0x10] sm:$0xff]   ;;  %v1032_v3 = vld [vmem:[#allocation11] sm:$0xff]  }
  0x7a   :  { %926 = vmatpush3.bf16.msra.mxu0 %v1018_v10  ;;  %v1027_v61 = vld [vmem:[#allocation11 + $0x28] sm:$0xff]   ;;  %p1258_p6 = por %p1257_p5, %p1256_p4 }
  0x7b   :  { %939 = vmatprep.subr.bf16.mxu0 %v1294_v8  ;;  %v850_v27 = vld [vmem:[%s1556_s25] ss:$0 sm:$0xff] }
  0x7c   :  { %934 = vmatpush3.bf16.msra.mxu1 %v1024_v55  ;;  %v1031_v2 = vld [vmem:[#allocation11 + $0x8] sm:$0xff]   ;;  %p1259_p7 = pnand %p1258_p6, %p1252_p3 }
  0x7d   :  { %951 = vmatprep.subr.bf16.mxu1 %v1294_v8 }
  0x83   :  { %v1046_v6 = vpop.eup %1045 }
  0x84   :  { %v182_v9 = vadd.f32 1.0, %v1046_v6 }
  0x86   :  { %1047 = vrcp.f32 %v182_v9 }
  0x93   :  { %v1048_v11 = vpop.eup %1047 }
  0x94   :  { %v185_v12 = vmul.f32 %v1048_v11, %v178_v4 }
  0x96   :  { %v186_v14 = vpack.c.bf16 %v185_v12, %v185_v12 }
  0x98   :  { %928 = vmatmul.mubr.msk.bf16.vlgmr.msra.gmra.mxu0 %vm203_vm2, %v186_v14  ;;  %v859_v14 = vld [vmem:[%s1537_s8] ss:$0 sm:$0xff] }
  0x99   :  { %940 = vmatpush3.bf16.msra.mxu0 %v1019_v13  ;;  %947 = vmatprep.mubr.msk.bf16.mxu0 %vm1295_vm1, %v1294_v8 }
  0x9a   :  { %941 = vmatprep.subr.bf16.mxu0 %v1294_v8 }
  0x9d   :  { %942 = vmatpush3.bf16.msra.mxu0 %v1020_v15 }
  0x9e   :  { %943 = vmatprep.subr.bf16.mxu0 %v1294_v8 }
  0xa1   :  { %944 = vmatpush3.bf16.msra.mxu0 %v1021_v16  ;;  %v860_v16 = vld [vmem:[%s1538_s9] ss:$0 sm:$0xff] }
  0xa2   :  { %945 = vmatprep.subr.bf16.mxu0 %v1294_v8 }
  0xa5   :  { %946 = vmatpush3.bf16.msra.mxu0 %v1022_v17 }
  0xa6   :  { %971 = vmatprep.subr.bf16.mxu0 %v1294_v8 }
  0xfe   :  { %v321_v18 = vpop.xlane.xlu0 %320 }
  0xff   :  { %v323_v19 = vmul.f32 0.015625, %v321_v18 }
 0x101   :  { %v329_v21 = vmul.f32 %v323_v19, %v323_v19  ;;  %v331_v25 = vsub.f32 %v1439_v0, %v323_v19 }
 0x102   :  { %v327_v20 = vpop.xlane.xlu0 %326 }
 0x103   :  { %v328_v22 = vmul.f32 0.015625, %v327_v20 }
 0x105   :  { %v330_v23 = vsub.f32 %v328_v22, %v329_v21 }
 0x107   :  { %v332_v24 = vadd.f32 1e-05, %v330_v23 }
 0x109   :  { %1049 = vrsqrt.f32 %v332_v24 }
 0x116   :  { %v1050_v26 = vpop.eup %1049 }
 0x117   :  { %v334_v28 = vmul.f32 %v1050_v26, %v331_v25 }
 0x119   :  { %v341_v30 = vmul.f32 %v850_v27, %v334_v28 }
 0x11b   :  { %v348_v31 = vadd.f32 %v851_v29, %v341_v30  ;;  %v870_v30 = vld [vmem:[#allocation13] ss:$0 sm:$0xff] }
 0x11d   :  { %v852_v32 = vmul.f32 -1.442695, %v348_v31 }
 0x11f   :  { %1051 = vpow2.f32 %v852_v32 }
 0x12c   :  { %v1052_v33 = vpop.eup %1051 }
 0x12d   :  { %v352_v34 = vadd.f32 1.0, %v1052_v33 }
 0x12f   :  { %1053 = vrcp.f32 %v352_v34 }
 0x130   :  { %1055 = vpow2.f32 %v846_v51 }
 0x13c   :  { %v1054_v35 = vpop.eup %1053 }
 0x13d   :  { %v355_v36 = vmul.f32 %v1054_v35, %v348_v31  ;;  %v1056_v52 = vpop.eup %1055 }
 0x13e   :  { %v251_v53 = vadd.f32 1.0, %v1056_v52 }
 0x13f   :  { %v356_v37 = vpack.c.bf16 %v355_v36, %v355_v36 }
 0x140   :  { %1057 = vrcp.f32 %v251_v53 }
 0x141   :  { %948 = vmatmul.mubr.msk.bf16.vlgmr.msra.gmra.mxu0 %vm318_vm0, %v356_v37  ;;  %v1033_v37 = vld [vmem:[#allocation14 + $0x38] sm:$0xff]  }
 0x142   :  { %987 = vmatprep.mubr.msk.bf16.mxu0 %vm1295_vm1, %v1294_v8  ;;  %972 = vmatpush3.bf16.msra.mxu0 %v1033_v37 }
 0x143   :  { %973 = vmatprep.subr.bf16.mxu0 %v1294_v8 }
 0x14d   :  { %v1058_v56 = vpop.eup %1057 }
 0x14e   :  { %v254_v57 = vmul.f32 %v1058_v56, %v247_v50 }
 0x150   :  { %v255_v59 = vpack.c.bf16 %v254_v57, %v254_v57 }
 0x152   :  { %936 = vmatmul.mubr.msk.bf16.vlgmr.msra.gmra.mxu1 %vm203_vm2, %v255_v59 }
 0x153   :  { %952 = vmatpush3.bf16.msra.mxu1 %v1025_v58  ;;  %967 = vmatprep.mubr.msk.bf16.mxu1 %vm1295_vm1, %v1294_v8  ;;  %v871_v58 = vld [vmem:[%s1542_s13] ss:$0 sm:$0xff] }
 0x154   :  { %953 = vmatprep.subr.bf16.mxu1 %v1294_v8 }
 0x157   :  { %954 = vmatpush3.bf16.msra.mxu1 %v1026_v60 }
 0x158   :  { %v241_v38 = vpop.f32.mrf.mxu0  ;;  %955 = vmatprep.subr.bf16.mxu1 %v1294_v8 }
 0x15a   :  { %v929_v39 = vpop.f32.mrf.mxu0 }
 0x15b   :  { %956 = vmatpush3.bf16.msra.mxu1 %v1027_v61  ;;  %v1034_v39 = vld [vmem:[#allocation14 + $0x30] sm:$0xff]  }
 0x15c   :  { %v244_v40 = vpop.f32.mrf.mxu0  ;;  %957 = vmatprep.subr.bf16.mxu1 %v1294_v8  ;;  %974 = vmatpush3.bf16.msra.mxu0 %v1034_v39 }
 0x15d   :  { %v1038_v40 = vld [vmem:[#allocation16 + $0x10] sm:$0xff]   ;;  %975 = vmatprep.subr.bf16.mxu0 %v1294_v8 }
 0x15e   :  { %v930_v41 = vpop.f32.mrf.mxu0 }
 0x15f   :  { %958 = vmatpush3.bf16.msra.mxu1 %v1028_v62  ;;  %v1035_v41 = vld [vmem:[#allocation14 + $0x28] sm:$0xff]  }
 0x160   :  { %959 = vmatprep.subr.bf16.mxu1 %v1294_v8  ;;  %976 = vmatpush3.bf16.msra.mxu0 %v1035_v41 }
 0x161   :  { %977 = vmatprep.subr.bf16.mxu0 %v1294_v8 }
 0x163   :  { %960 = vmatpush3.bf16.msra.mxu1 %v1029_v63 }
 0x164   :  { %961 = vmatprep.subr.bf16.mxu1 %v1294_v8 }
 0x167   :  { %962 = vmatpush3.bf16.msra.mxu1 %v1030_v1 }
 0x168   :  { %963 = vmatprep.subr.bf16.mxu1 %v1294_v8 }
 0x16b   :  { %964 = vmatpush3.bf16.msra.mxu1 %v1031_v2 }
 0x16c   :  { %965 = vmatprep.subr.bf16.mxu1 %v1294_v8 }
 0x16f   :  { %966 = vmatpush3.bf16.msra.mxu1 %v1032_v3 }
 0x170   :  { %991 = vmatprep.subr.bf16.mxu1 %v1294_v8 }
 0x201   :  { %v426_v42 = vpop.f32.mrf.mxu0 }
 0x202   :  { %v427_v44 = vadd.f32 %v426_v42, %v241_v38  ;;  %v1036_v38 = vld [vmem:[#allocation16 + $0x18] sm:$0xff]   ;;  %v1040_v42 = vld [vmem:[#allocation16 + $0x8] sm:$0xff]  }
 0x203   :  { %v949_v45 = vpop.f32.mrf.mxu0 }
 0x204   :  { %v439_v46 = vadd.f32 %v858_v43, %v427_v44  ;;  %v1037_v43 = vld [vmem:[#allocation14 + $0x20] sm:$0xff]   ;;  %v738_v45 = vpack.c.bf16 %v1439_v0, %v1439_v0 }
 0x205   :  { %v429_v47 = vpop.f32.mrf.mxu0  ;;  %v1042_v44 = vld [vmem:[#allocation16] sm:$0xff]   ;;  %978 = vmatpush3.bf16.msra.mxu0 %v1037_v43 }
 0x206   :  { %442 = vadd.xlane.f32.xlu1 %v439_v46  ;;  %v446_v49 = vmul.f32 %v439_v46, %v439_v46  ;;  %979 = vmatprep.subr.bf16.mxu0 %v1294_v8  ;;  %v1041_v47 = vld [vmem:[#allocation14 + $0x10] sm:$0xff]  }
 0x207   :  { %v950_v48 = vpop.f32.mrf.mxu0 }
 0x208   :  { %v1043_v48 = vld [vmem:[#allocation14 + $0x8] sm:$0xff]  }
 0x20a   :  { %447 = vadd.xlane.f32.xlu1 %v446_v49  ;;  %v1044_v49 = vld [vmem:[#allocation14] sm:$0xff]  }
 0x212   :  { %v309_v25 = vpop.f32.mrf.mxu1 }
 0x214   :  { %v937_v26 = vpop.f32.mrf.mxu1 }
 0x216   :  { %v312_v27 = vpop.f32.mrf.mxu1 }
 0x218   :  { %v938_v28 = vpop.f32.mrf.mxu1 }
 0x28f   :  { %v443_v4 = vpop.xlane.xlu1 %442 }
 0x290   :  { %v445_v5 = vmul.f32 0.0078125, %v443_v4 }
 0x292   :  { %v450_v7 = vmul.f32 %v445_v5, %v445_v5  ;;  %v452_v12 = vsub.f32 %v439_v46, %v445_v5  ;;  %v1039_v46 = vld [vmem:[#allocation14 + $0x18] sm:$0xff]  }
 0x293   :  { %v448_v6 = vpop.xlane.xlu1 %447  ;;  %980 = vmatpush3.bf16.msra.mxu0 %v1039_v46 }
 0x294   :  { %v449_v9 = vmul.f32 0.0078125, %v448_v6  ;;  %981 = vmatprep.subr.bf16.mxu0 %v1294_v8 }
 0x296   :  { %v451_v10 = vsub.f32 %v449_v9, %v450_v7 }
 0x297   :  { %982 = vmatpush3.bf16.msra.mxu0 %v1041_v47 }
 0x298   :  { %v453_v11 = vadd.f32 1e-05, %v451_v10  ;;  %983 = vmatprep.subr.bf16.mxu0 %v1294_v8  ;;  %v883_v10 = vld [vmem:[%s1547_s18] ss:$0 sm:$0xff] }
 0x29a   :  { %1059 = vrsqrt.f32 %v453_v11  ;;  %v874_v11 = vld [vmem:[%s1545_s16] ss:$0 sm:$0xff] }
 0x29b   :  { %984 = vmatpush3.bf16.msra.mxu0 %v1043_v48 }
 0x29c   :  { %985 = vmatprep.subr.bf16.mxu0 %v1294_v8 }
 0x29f   :  { %986 = vmatpush3.bf16.msra.mxu0 %v1044_v49 }
 0x2a7   :  { %v1060_v13 = vpop.eup %1059 }
 0x2a8   :  { %v455_v15 = vmul.f32 %v1060_v13, %v452_v12 }
 0x2aa   :  { %v462_v17 = vmul.f32 %v859_v14, %v455_v15 }
 0x2ac   :  { %v469_v18 = vadd.f32 %v860_v16, %v462_v17 }
 0x2ae   :  { %v861_v19 = vmul.f32 -1.442695, %v469_v18 }
 0x2b0   :  { %1061 = vpow2.f32 %v861_v19 }
 0x2bd   :  { %v1062_v20 = vpop.eup %1061 }
 0x2be   :  { %v473_v21 = vadd.f32 1.0, %v1062_v20 }
 0x2c0   :  { %1063 = vrcp.f32 %v473_v21 }
 0x2cd   :  { %v1064_v22 = vpop.eup %1063 }
 0x2ce   :  { %v476_v23 = vmul.f32 %v1064_v22, %v469_v18 }
 0x2d0   :  { %v477_v24 = vpack.c.bf16 %v476_v23, %v476_v23 }
 0x2d2   :  { %968 = vmatmul.mubr.bf16.vlgmr.msra.gmra.mxu1 %v477_v24 }
 0x2d3   :  { %999 = vmatprep.mubr.msk.bf16.mxu1 %vm1295_vm1, %v1294_v8  ;;  %992 = vmatpush3.bf16.msra.mxu1 %v1036_v38 }
 0x2d4   :  { %993 = vmatprep.subr.bf16.mxu1 %v1294_v8 }
 0x2d7   :  { %994 = vmatpush3.bf16.msra.mxu1 %v1038_v40 }
 0x2d8   :  { %995 = vmatprep.subr.bf16.mxu1 %v1294_v8 }
 0x2db   :  { %996 = vmatpush3.bf16.msra.mxu1 %v1040_v42 }
 0x2dc   :  { %997 = vmatprep.subr.bf16.mxu1 %v1294_v8  ;;  %v872_v8 = vld [vmem:[%s1543_s14] ss:$0 sm:$0xff] }
 0x2df   :  { %998 = vmatpush3.bf16.msra.mxu1 %v1042_v44 }
 0x2e2   :  { %1000 = vmatmul.mubr.msk.bf16.vlgmr.msra.gmra.mxu1 %vm318_vm0, %v738_v45 }
 0x392   :  { %v576_v29 = vpop.f32.mrf.mxu1 }
 0x393   :  { %v577_v31 = vadd.f32 %v576_v29, %v309_v25 }
 0x394   :  { %v969_v32 = vpop.f32.mrf.mxu1 }
 0x395   :  { %v589_v33 = vadd.f32 %v870_v30, %v577_v31 }
 0x396   :  { %v579_v34 = vpop.f32.mrf.mxu1 }
 0x397   :  { %592 = vadd.xlane.f32.xlu0 %v589_v33  ;;  %v595_v35 = vmul.f32 %v589_v33, %v589_v33 }
 0x398   :  { %v970_v36 = vpop.f32.mrf.mxu1 }
 0x399   :  { %596 = vadd.xlane.f32.xlu1 %v595_v35 }
 0x3a2   :  { %v815_v5 = vpop.f32.mrf.mxu1 }
 0x3a3   :  { %v816_v12 = vadd.f32 %v883_v10, %v815_v5 }
 0x3a4   :  { %v1001_v6 = vpop.f32.mrf.mxu1 }
 0x3a6   :  { %v818_v7 = vpop.f32.mrf.mxu1 }
 0x3a8   :  { %v1002_v9 = vpop.f32.mrf.mxu1 }
 0x420   :  { %v593_v0 = vpop.xlane.xlu0 %592 }
 0x421   :  { %v594_v50 = vmul.f32 0.0078125, %v593_v0 }
 0x422   :  { %v597_v51 = vpop.xlane.xlu1 %596 }
 0x423   :  { %v599_v52 = vmul.f32 %v594_v50, %v594_v50  ;;  %v598_v53 = vmul.f32 0.0078125, %v597_v51  ;;  %v601_v56 = vsub.f32 %v589_v33, %v594_v50 }
 0x425   :  { %v600_v54 = vsub.f32 %v598_v53, %v599_v52 }
 0x427   :  { %v602_v55 = vadd.f32 1e-05, %v600_v54 }
 0x429   :  { %1065 = vrsqrt.f32 %v602_v55 }
 0x436   :  { %v1066_v57 = vpop.eup %1065 }
 0x437   :  { %v604_v59 = vmul.f32 %v1066_v57, %v601_v56 }
 0x439   :  { %v611_v60 = vmul.f32 %v871_v58, %v604_v59 }
 0x43b   :  { %v618_v61 = vadd.f32 %v872_v8, %v611_v60 }
 0x43d   :  { %v873_v62 = vmul.f32 -1.442695, %v618_v61 }
 0x43f   :  { %1067 = vpow2.f32 %v873_v62 }
 0x44c   :  { %v1068_v63 = vpop.eup %1067 }
 0x44d   :  { %v622_v1 = vadd.f32 1.0, %v1068_v63 }
 0x44f   :  { %1069 = vrcp.f32 %v622_v1 }
 0x45c   :  { %v1070_v2 = vpop.eup %1069 }
 0x45d   :  { %v625_v3 = vmul.f32 %v1070_v2, %v618_v61 }
 0x45f   :  { %v626_v4 = vpack.c.bf16 %v625_v3, %v625_v3 }
 0x461   :  { %988 = vmatmul.mubr.bf16.vlgmr.msra.gmra.mxu0 %v626_v4 }
 0x521   :  { %v732_v13 = vpop.f32.mrf.mxu0 }
 0x522   :  { %v733_v14 = vadd.f32 %v874_v11, %v732_v13 }
 0x523   :  { %v989_v15 = vpop.f32.mrf.mxu0 }
 0x524   :  { %v821_v16 = vadd.f32 %v816_v12, %v733_v14 }
 0x525   :  { %v735_v17 = vpop.f32.mrf.mxu0 }
 0x526   :  { %822 = vst [vmem:[#allocation17] sm:$0xff] %v821_v16 }
 0x527   :  { %v990_v18 = vpop.f32.mrf.mxu0 }
 0x528   :  { %1262 = shalt.err (!%p1259_p7)
}
 0x529   :  { %832 = dma.vmem_to_hbm [thread:$0]  %s830_s20, 128, %s1548_s19, [#allocation4]  }
 0x52a   :  { %1281 = dma.done.wait [#allocation4], 128  }
 0x52b   :  { %1282 = vsyncadd [#allocation4], 4294967168 }
 0x52c   :  { %836 = vsyncpa [#allocation3], 1 }
 0x52d   :  { %837 = vsyncpa [#allocation6], 1 }
 0x52e   :  { %838 = vsyncpa [#allocation9], 1 }
 0x52f   :  { %839 = vsyncpa [#allocation12], 1 }
 0x530   :  { %840 = vsyncpa [#allocation15], 1 }
 0x531   :  { %841 = vsyncpa [#allocation4], 1 }

</bundles_post_ra>
